<compile_context>
chip_gen: v6e
topology: v6e:2x2x1
jax: 0.10.0
libtpu: 0.0.40
codegen_flags: <defaults>
</compile_context>

<pallas_src>
import jax
import jax.numpy as jnp
from jax import lax
from jax.experimental import pallas as pl
from jax.experimental.pallas import tpu as pltpu

NEG_INF = -1e30  # stand-in for -INF in masked_fill_ (avoids NaN on fully-masked rows)


# --------------------------------------------------------------------------- #
# Kernel
# --------------------------------------------------------------------------- #
def _make_kernel(compute_dtype):
    def kernel(wt_ref, ctx_ref, ansfc_ref, oans_ref, bias_ref, o_ref):
        # context projection for this L tile: relu(ctx @ W^T), f32 accumulate
        ctx = ctx_ref[0]                                    # (TL, D) compute_dtype
        wt = wt_ref[...]                                    # (D, H)  compute_dtype
        ctx_fc = jnp.maximum(
            jnp.dot(ctx, wt, preferred_element_type=jnp.float32), 0.0)   # (TL, H) f32

        # attention = ctx_fc @ ans_fc^T  -- ans_fc is passed pre-transposed as
        # (H, N), so this is an MXU-native (TL,H) x (H,N) contraction.
        att = jnp.dot(ctx_fc.astype(compute_dtype), ansfc_ref[0],
                      preferred_element_type=jnp.float32)                # (TL, N) f32

        # additive mask bias (precomputed in the wrapper)
        att = att + bias_ref[0, 0][None, :]

        # numerically-stable softmax over N (f32); denominator reciprocal on
        # the EUP (approx) + one Newton step to recover full f32 accuracy.
        m = jnp.max(att, axis=-1, keepdims=True)
        p = jnp.exp(att - m)
        s = jnp.sum(p, axis=-1, keepdims=True)
        r = pl.reciprocal(s, approx=True)
        r = r * (2.0 - s * r)                               # Newton refinement
        prob = (p * r).astype(compute_dtype)                # (TL, N)

        # ques_emb = prob @ out_answers
        o_ref[0] = jnp.dot(prob, oans_ref[0],
                           preferred_element_type=jnp.float32).astype(o_ref.dtype)

    return kernel


# --------------------------------------------------------------------------- #
# VMEM budgeting helpers (generation-aware)
# --------------------------------------------------------------------------- #
def _vmem_capacity_bytes():
    try:
        return int(pltpu.get_tpu_info().vmem_capacity_bytes)
    except Exception:
        return 64 * 1024 * 1024  # conservative: v7x per-TensorCore VMEM


def _vmem_need_bytes(tl, d, h, n, cbytes, invariant_bufs=1):
    # grid-invariant operands (W^T, ans_fc^T, out_answers, bias)
    inv = ((d * h + h * n + n * d) * cbytes + n * 4) * invariant_bufs
    # pipelined context tile (2 bufs, compute dtype) + output tile (2 bufs, f32)
    io = 2 * tl * d * cbytes + 2 * tl * d * 4
    # in-kernel temporaries: ctx_fc (f32 + cast), att/p/prob (f32), final acc
    tmp = tl * h * (4 + cbytes) + 3 * tl * n * 4 + tl * d * 4
    return inv + io + tmp


def _choose_tile_l(d, h, n, cbytes, vmem_cap):
    # Cap TL at 256 on 64-MiB-VMEM parts (v7x); 1024 on v5e/v6e (128 MiB),
    # where 512 already reaches ~85% of HBM roofline so bigger is marginal.
    cap = 256 if vmem_cap <= 64 * 1024 * 1024 else 1024
    budget = int(vmem_cap * 0.45)  # leave headroom for compiler-internal scratch
    tl = cap
    while tl > 8 and _vmem_need_bytes(tl, d, h, n, cbytes, invariant_bufs=2) > budget:
        tl //= 2
    return max(tl, 8)


# --------------------------------------------------------------------------- #
# Wrapper
# --------------------------------------------------------------------------- #
def context2answer_attention(w, context, answers, out_answers, ans_mask=None,
                             *, compute_dtype=jnp.float32, tile_l=None):
    """Pallas forward pass of Context2AnswerAttention.

    w:            (H, D) linear_sim.weight (PyTorch convention, y = x @ W.T)
    context:      (B, L, D)
    answers:      (B, N, D)
    out_answers:  (B, N, D)
    ans_mask:     (B, N) or None
    Returns (B, L, D) float32.
    """
    B, L, D = context.shape
    _, N, _ = answers.shape
    H = w.shape[0]
    cd = jnp.dtype(compute_dtype)
    cbytes = cd.itemsize

    # Cast MXU operands in the wrapper: bf16 path ships bf16 over HBM.
    w_t = jnp.asarray(w, jnp.float32).T.astype(cd)                       # (D, H)
    context = context.astype(cd)
    out_answers = out_answers.astype(cd)

    # ans_fc = relu(answers @ W^T), hoisted out of the kernel and passed in
    # pre-transposed (B, H, N) for an MXU-native in-kernel contraction.
    ans_fc = jax.nn.relu(
        jnp.einsum("bnd,dh->bnh", answers.astype(cd), w_t,
                   preferred_element_type=jnp.float32,
                   precision=lax.Precision.HIGHEST))                     # (B, N, H) f32
    ans_fc_t = jnp.swapaxes(ans_fc, 1, 2).astype(cd)                     # (B, H, N)

    # Additive mask bias (B, 1, N), kept in f32.
    if ans_mask is None:
        bias = jnp.zeros((B, 1, N), jnp.float32)
    else:
        bias = ((1.0 - ans_mask.astype(jnp.float32)) * NEG_INF).reshape(B, 1, N)

    # ---- L tiling (keep N whole so softmax stays inside a tile) ----
    vmem_cap = _vmem_capacity_bytes()
    if tile_l is None:
        tile_l = _choose_tile_l(D, H, N, cbytes, vmem_cap)
    tile_l = max(8, (tile_l // 8) * 8)
    if L <= tile_l:
        TL, L_pad = L, L
    else:
        TL = tile_l
        L_pad = pl.cdiv(L, TL) * TL
    if L_pad != L:
        context = jnp.pad(context, ((0, 0), (0, L_pad - L), (0, 0)))
    num_l = L_pad // TL

    # ---- VMEM limit derived from actual block + temporary sizes ----
    need = _vmem_need_bytes(TL, D, H, N, cbytes, invariant_bufs=2)
    vmem_limit = int(min(int(vmem_cap * 0.75),
                         max(32 * 1024 * 1024, 2 * need)))

    # ---- advisory cost estimate for XLA scheduling around the kernel ----
    flops = 2 * B * L_pad * (D * H + H * N + N * D)
    bytes_accessed = (context.size * cbytes + ans_fc_t.size * cbytes
                      + out_answers.size * cbytes + w_t.size * cbytes
                      + bias.size * 4 + B * L_pad * D * 4)
    cost = pl.CostEstimate(flops=int(flops),
                           transcendentals=int(B * L_pad * N),
                           bytes_accessed=int(bytes_accessed))

    def _call(single_buffer_invariants):
        inv_kw = ({"pipeline_mode": pl.Buffered(1)}
                  if single_buffer_invariants else {})
        grid_spec = pltpu.PrefetchScalarGridSpec(
            num_scalar_prefetch=0,
            grid=(B, num_l),
            in_specs=[
                pl.BlockSpec((D, H), lambda b, l: (0, 0), **inv_kw),       # W^T (shared)
                pl.BlockSpec((1, TL, D), lambda b, l: (b, l, 0)),          # context tile
                pl.BlockSpec((1, H, N), lambda b, l: (b, 0, 0), **inv_kw), # ans_fc^T (per-b)
                pl.BlockSpec((1, N, D), lambda b, l: (b, 0, 0), **inv_kw), # out_answers (per-b)
                pl.BlockSpec((1, 1, N), lambda b, l: (b, 0, 0), **inv_kw), # mask bias (per-b)
            ],
            out_specs=pl.BlockSpec((1, TL, D), lambda b, l: (b, l, 0)),
        )
        return pl.pallas_call(
            _make_kernel(cd),
            out_shape=jax.ShapeDtypeStruct((B, L_pad, D), jnp.float32),
            grid_spec=grid_spec,
            compiler_params=pltpu.CompilerParams(
                # No cross-iteration state anymore: both axes are parallel
                # (megacore sharding over B *and* L tiles on v7x).
                dimension_semantics=("parallel", "parallel"),
                vmem_limit_bytes=vmem_limit),
            cost_estimate=cost,
        )(w_t, context, ans_fc_t, out_answers, bias)

    try:
        out = _call(True)
    except Exception:
        # Fallback if this jax build rejects pipeline_mode=pl.Buffered(1):
        # identical semantics, default double buffering.
        out = _call(False)

    return out[:, :L, :]


# --------------------------------------------------------------------------- #
# Pure-JAX reference (mirrors the kernel's precision choices)
# --------------------------------------------------------------------------- #
def _reference(w, context, answers, out_answers, ans_mask, compute_dtype=jnp.float32):
    cd = compute_dtype
    hp = lax.Precision.HIGHEST
    wt = jnp.asarray(w, jnp.float32).T.astype(cd)              # (D, H)
    ctx_fc = jax.nn.relu(jnp.einsum("bld,dh->blh", context.astype(cd), wt,
                                    preferred_element_type=jnp.float32, precision=hp))
    ans_fc = jax.nn.relu(jnp.einsum("bnd,dh->bnh", answers.astype(cd), wt,
                                    preferred_element_type=jnp.float32, precision=hp))
    att = jnp.einsum("blh,bnh->bln", ctx_fc.astype(cd), ans_fc.astype(cd),
                     preferred_element_type=jnp.float32, precision=hp)
    if ans_mask is not None:
        att = att + ((1.0 - ans_mask.astype(jnp.float32)) * NEG_INF)[:, None, :]
    prob = jax.nn.softmax(att, axis=-1)
    return jnp.einsum("bln,bnd->bld", prob.astype(cd), out_answers.astype(cd),
                      preferred_element_type=jnp.float32, precision=hp)


if __name__ == "__main__":
    B, L, N, D, H = 2, 16, 8, 32, 32

    key = jax.random.PRNGKey(0)
    k_w, k_c, k_a, k_o, k_m = jax.random.split(key, 5)

    # Deterministic "parameter" init for nn.Linear(dim, hidden_size, bias=False)
    w = jax.random.normal(k_w, (H, D), dtype=jnp.float32) * 0.1

    context = jax.random.normal(k_c, (B, L, D), dtype=jnp.float32)
    answers = jax.random.normal(k_a, (B, N, D), dtype=jnp.float32)
    out_answers = jax.random.normal(k_o, (B, N, D), dtype=jnp.float32)
    # 0/1 mask, make sure every row has at least one valid answer
    ans_mask = (jax.random.uniform(k_m, (B, N)) > 0.3).astype(jnp.float32)
    ans_mask = ans_mask.at[:, 0].set(1.0)

    # --- 1) f32 path, strict check vs f32 reference ---
    out_f32 = context2answer_attention(w, context, answers, out_answers, ans_mask,
                                       compute_dtype=jnp.float32)
    out_f32 = jax.block_until_ready(out_f32)
    ref_f32 = _reference(w, context, answers, out_answers, ans_mask, jnp.float32)
    assert out_f32.shape == (B, L, D)
    assert jnp.allclose(out_f32, ref_f32, atol=1e-4, rtol=1e-4), "f32 mismatch vs reference"

    # --- 2) bf16 MXU-operand path (f32 accumulation), vs bf16-matched reference ---
    out_bf16 = context2answer_attention(w, context, answers, out_answers, ans_mask,
                                        compute_dtype=jnp.bfloat16)
    out_bf16 = jax.block_until_ready(out_bf16)
    ref_bf16 = _reference(w, context, answers, out_answers, ans_mask, jnp.bfloat16)
    assert jnp.allclose(out_bf16, ref_bf16, atol=2e-2, rtol=2e-2), "bf16 mismatch vs reference"

    # --- 3) exercise the L-tiling path (multiple L tiles) ---
    L2 = 32
    ctx2 = jax.random.normal(jax.random.PRNGKey(1), (B, L2, D), dtype=jnp.float32)
    out_t = context2answer_attention(w, ctx2, answers, out_answers, ans_mask,
                                     compute_dtype=jnp.float32, tile_l=16)
    out_t = jax.block_until_ready(out_t)
    ref_t = _reference(w, ctx2, answers, out_answers, ans_mask, jnp.float32)
    assert jnp.allclose(out_t, ref_t, atol=1e-4, rtol=1e-4), "tiled-L mismatch vs reference"

    # --- 4) no-mask path ---
    out_nm = context2answer_attention(w, context, answers, out_answers, None)
    out_nm = jax.block_until_ready(out_nm)
    ref_nm = _reference(w, context, answers, out_answers, None, jnp.float32)
    assert jnp.allclose(out_nm, ref_nm, atol=1e-4, rtol=1e-4), "no-mask mismatch vs reference"

    print("KERNEL_OK")
</pallas_src>

<mosaic_0001>
module attributes {stable_mosaic.version = 11 : i64} {
  func.func @kernel(%arg0: i32, %arg1: i32, %arg2: memref<32x32xf32, #tpu.memory_space<vmem>>, %arg3: memref<1x16x32xf32, #tpu.memory_space<vmem>>, %arg4: memref<1x32x8xf32, #tpu.memory_space<vmem>>, %arg5: memref<1x8x32xf32, #tpu.memory_space<vmem>>, %arg6: memref<1x1x8xf32, #tpu.memory_space<vmem>>, %arg7: memref<1x16x32xf32, #tpu.memory_space<vmem>>) attributes {dimension_semantics = [#tpu.dimension_semantics<parallel>, #tpu.dimension_semantics<parallel>], iteration_bounds = array<i64: 2, 1>, scalar_prefetch = 0 : i64, scratch_operands = 0 : i64, tpu.core_type = #tpu.core_type<tc>, window_params = [{pipeline_mode = #tpu.pipeline_mode<synchronous>, transform_indices = @transform_0, window_bounds = array<i64: 32, 32>}, {transform_indices = @transform_1, window_bounds = array<i64: 1, 16, 32>}, {pipeline_mode = #tpu.pipeline_mode<synchronous>, transform_indices = @transform_2, window_bounds = array<i64: 1, 32, 8>}, {pipeline_mode = #tpu.pipeline_mode<synchronous>, transform_indices = @transform_3, window_bounds = array<i64: 1, 8, 32>}, {pipeline_mode = #tpu.pipeline_mode<synchronous>, transform_indices = @transform_4, window_bounds = array<i64: 1, 1, 8>}, {transform_indices = @transform_5, window_bounds = array<i64: 1, 16, 32>}]} {
    %c0 = arith.constant 0 : index
    %c0_0 = arith.constant 0 : index
    %c0_1 = arith.constant 0 : index
    %0 = vector.load %arg3[%c0, %c0_0, %c0_1] : memref<1x16x32xf32, #tpu.memory_space<vmem>>, vector<1x16x32xf32>
    %1 = vector.shape_cast %0 : vector<1x16x32xf32> to vector<16x32xf32>
    %c0_2 = arith.constant 0 : index
    %c0_3 = arith.constant 0 : index
    %2 = vector.load %arg2[%c0_2, %c0_3] : memref<32x32xf32, #tpu.memory_space<vmem>>, vector<32x32xf32>
    %cst = arith.constant dense<0.000000e+00> : vector<16x32xf32>
    %3 = tpu.matmul %1, %2, %cst {dimension_numbers = #tpu.dot_dimension_numbers<[1], [0], [0], [1], [0, 0, 1, 1], [], []>} : vector<16x32xf32>, vector<32x32xf32>, vector<16x32xf32> -> vector<16x32xf32>
    %cst_4 = arith.constant 0.000000e+00 : f32
    %4 = vector.broadcast %cst_4 : f32 to vector<16x32xf32>
    %5 = arith.maximumf %3, %4 : vector<16x32xf32>
    %c0_5 = arith.constant 0 : index
    %c0_6 = arith.constant 0 : index
    %c0_7 = arith.constant 0 : index
    %6 = vector.load %arg4[%c0_5, %c0_6, %c0_7] : memref<1x32x8xf32, #tpu.memory_space<vmem>>, vector<1x32x8xf32>
    %7 = vector.shape_cast %6 : vector<1x32x8xf32> to vector<32x8xf32>
    %cst_8 = arith.constant dense<0.000000e+00> : vector<16x8xf32>
    %8 = tpu.matmul %5, %7, %cst_8 {dimension_numbers = #tpu.dot_dimension_numbers<[1], [0], [0], [1], [0, 0, 1, 1], [], []>} : vector<16x32xf32>, vector<32x8xf32>, vector<16x8xf32> -> vector<16x8xf32>
    %c0_9 = arith.constant 0 : index
    %c0_10 = arith.constant 0 : index
    %c0_11 = arith.constant 0 : index
    %9 = vector.load %arg6[%c0_9, %c0_10, %c0_11] : memref<1x1x8xf32, #tpu.memory_space<vmem>>, vector<1x1x8xf32>
    %10 = vector.shape_cast %9 : vector<1x1x8xf32> to vector<8xf32>
    %11 = vector.shape_cast %10 : vector<8xf32> to vector<1x8xf32>
    %12 = vector.broadcast %11 : vector<1x8xf32> to vector<16x8xf32>
    %13 = arith.addf %8, %12 : vector<16x8xf32>
    %cst_12 = arith.constant dense<0xFF800000> : vector<16xf32>
    %14 = vector.multi_reduction <maximumf>, %13, %cst_12 [1] : vector<16x8xf32> to vector<16xf32>
    %15 = vector.shape_cast %14 : vector<16xf32> to vector<16x1xf32>
    %16 = vector.broadcast %15 : vector<16x1xf32> to vector<16x8xf32>
    %17 = arith.subf %13, %16 : vector<16x8xf32>
    %18 = math.exp %17 : vector<16x8xf32>
    %cst_13 = arith.constant dense<0.000000e+00> : vector<16xf32>
    %19 = vector.multi_reduction <add>, %18, %cst_13 [1] : vector<16x8xf32> to vector<16xf32>
    %20 = vector.shape_cast %19 : vector<16xf32> to vector<16x1xf32>
    %21 = tpu.reciprocal %20 {approx = true} : vector<16x1xf32> -> vector<16x1xf32>
    %22 = arith.mulf %20, %21 : vector<16x1xf32>
    %cst_14 = arith.constant 2.000000e+00 : f32
    %23 = vector.broadcast %cst_14 : f32 to vector<16x1xf32>
    %24 = arith.subf %23, %22 : vector<16x1xf32>
    %25 = arith.mulf %21, %24 : vector<16x1xf32>
    %26 = vector.broadcast %25 : vector<16x1xf32> to vector<16x8xf32>
    %27 = arith.mulf %18, %26 : vector<16x8xf32>
    %c0_15 = arith.constant 0 : index
    %c0_16 = arith.constant 0 : index
    %c0_17 = arith.constant 0 : index
    %28 = vector.load %arg5[%c0_15, %c0_16, %c0_17] : memref<1x8x32xf32, #tpu.memory_space<vmem>>, vector<1x8x32xf32>
    %29 = vector.shape_cast %28 : vector<1x8x32xf32> to vector<8x32xf32>
    %cst_18 = arith.constant dense<0.000000e+00> : vector<16x32xf32>
    %30 = tpu.matmul %27, %29, %cst_18 {dimension_numbers = #tpu.dot_dimension_numbers<[1], [0], [0], [1], [0, 0, 1, 1], [], []>} : vector<16x8xf32>, vector<8x32xf32>, vector<16x32xf32> -> vector<16x32xf32>
    %c0_19 = arith.constant 0 : index
    %c0_20 = arith.constant 0 : index
    %c0_21 = arith.constant 0 : index
    %31 = vector.load %arg7[%c0_19, %c0_20, %c0_21] : memref<1x16x32xf32, #tpu.memory_space<vmem>>, vector<1x16x32xf32>
    %32 = vector.shape_cast %31 : vector<1x16x32xf32> to vector<16x32xf32>
    %33 = vector.shape_cast %30 : vector<16x32xf32> to vector<1x16x32xf32>
    tpu.vector_store %arg7[%c0_19, %c0_20, %c0_21], %33 {strides = array<i32>} : memref<1x16x32xf32, #tpu.memory_space<vmem>>, vector<1x16x32xf32>,
    return
  }
  func.func @transform_0(%arg0: i32, %arg1: i32) -> (i32, i32) {
    %c0_i32 = arith.constant 0 : i32
    %c0_i32_0 = arith.constant 0 : i32
    %c0_i32_1 = arith.constant 0 : i32
    return %c0_i32, %c0_i32_0 : i32, i32
  }
  func.func @transform_1(%arg0: i32, %arg1: i32) -> (i32, i32, i32) {
    %c0_i32 = arith.constant 0 : i32
    %c0_i32_0 = arith.constant 0 : i32
    return %arg0, %arg1, %c0_i32 : i32, i32, i32
  }
  func.func @transform_2(%arg0: i32, %arg1: i32) -> (i32, i32, i32) {
    %c0_i32 = arith.constant 0 : i32
    %c0_i32_0 = arith.constant 0 : i32
    %c0_i32_1 = arith.constant 0 : i32
    return %arg0, %c0_i32, %c0_i32_0 : i32, i32, i32
  }
  func.func @transform_3(%arg0: i32, %arg1: i32) -> (i32, i32, i32) {
    %c0_i32 = arith.constant 0 : i32
    %c0_i32_0 = arith.constant 0 : i32
    %c0_i32_1 = arith.constant 0 : i32
    return %arg0, %c0_i32, %c0_i32_0 : i32, i32, i32
  }
  func.func @transform_4(%arg0: i32, %arg1: i32) -> (i32, i32, i32) {
    %c0_i32 = arith.constant 0 : i32
    %c0_i32_0 = arith.constant 0 : i32
    %c0_i32_1 = arith.constant 0 : i32
    return %arg0, %c0_i32, %c0_i32_0 : i32, i32, i32
  }
  func.func @transform_5(%arg0: i32, %arg1: i32) -> (i32, i32, i32) {
    %c0_i32 = arith.constant 0 : i32
    %c0_i32_0 = arith.constant 0 : i32
    return %arg0, %arg1, %c0_i32 : i32, i32, i32
  }
}

module attributes {stable_mosaic.version = 11 : i64} {
  func.func @kernel(%arg0: i32, %arg1: i32, %arg2: memref<32x32xf32, #tpu.memory_space<vmem>>, %arg3: memref<1x16x32xf32, #tpu.memory_space<vmem>>, %arg4: memref<1x32x8xf32, #tpu.memory_space<vmem>>, %arg5: memref<1x8x32xf32, #tpu.memory_space<vmem>>, %arg6: memref<1x1x8xf32, #tpu.memory_space<vmem>>, %arg7: memref<1x16x32xf32, #tpu.memory_space<vmem>>) attributes {dimension_semantics = [#tpu.dimension_semantics<parallel>, #tpu.dimension_semantics<parallel>], iteration_bounds = array<i64: 2, 1>, scalar_prefetch = 0 : i64, scratch_operands = 0 : i64, tpu.core_type = #tpu.core_type<tc>, window_params = [{pipeline_mode = #tpu.pipeline_mode<synchronous>, transform_indices = @transform_0, window_bounds = array<i64: 32, 32>}, {transform_indices = @transform_1, window_bounds = array<i64: 1, 16, 32>}, {transform_indices = @transform_2, window_bounds = array<i64: 1, 32, 8>}, {transform_indices = @transform_3, window_bounds = array<i64: 1, 8, 32>}, {transform_indices = @transform_4, window_bounds = array<i64: 1, 1, 8>}, {transform_indices = @transform_5, window_bounds = array<i64: 1, 16, 32>}]} {
    %c0 = arith.constant 0 : index
    %c0_0 = arith.constant 0 : index
    %c0_1 = arith.constant 0 : index
    %0 = vector.load %arg3[%c0, %c0_0, %c0_1] : memref<1x16x32xf32, #tpu.memory_space<vmem>>, vector<1x16x32xf32>
    %1 = vector.shape_cast %0 : vector<1x16x32xf32> to vector<16x32xf32>
    %c0_2 = arith.constant 0 : index
    %c0_3 = arith.constant 0 : index
    %2 = vector.load %arg2[%c0_2, %c0_3] : memref<32x32xf32, #tpu.memory_space<vmem>>, vector<32x32xf32>
    %cst = arith.constant dense<0.000000e+00> : vector<16x32xf32>
    %3 = tpu.matmul %1, %2, %cst {dimension_numbers = #tpu.dot_dimension_numbers<[1], [0], [0], [1], [0, 0, 1, 1], [], []>} : vector<16x32xf32>, vector<32x32xf32>, vector<16x32xf32> -> vector<16x32xf32>
    %cst_4 = arith.constant 0.000000e+00 : f32
    %4 = vector.broadcast %cst_4 : f32 to vector<16x32xf32>
    %5 = arith.maximumf %3, %4 : vector<16x32xf32>
    %c0_5 = arith.constant 0 : index
    %c0_6 = arith.constant 0 : index
    %c0_7 = arith.constant 0 : index
    %6 = vector.load %arg4[%c0_5, %c0_6, %c0_7] : memref<1x32x8xf32, #tpu.memory_space<vmem>>, vector<1x32x8xf32>
    %7 = vector.shape_cast %6 : vector<1x32x8xf32> to vector<32x8xf32>
    %cst_8 = arith.constant dense<0.000000e+00> : vector<16x8xf32>
    %8 = tpu.matmul %5, %7, %cst_8 {dimension_numbers = #tpu.dot_dimension_numbers<[1], [0], [0], [1], [0, 0, 1, 1], [], []>} : vector<16x32xf32>, vector<32x8xf32>, vector<16x8xf32> -> vector<16x8xf32>
    %c0_9 = arith.constant 0 : index
    %c0_10 = arith.constant 0 : index
    %c0_11 = arith.constant 0 : index
    %9 = vector.load %arg6[%c0_9, %c0_10, %c0_11] : memref<1x1x8xf32, #tpu.memory_space<vmem>>, vector<1x1x8xf32>
    %10 = vector.shape_cast %9 : vector<1x1x8xf32> to vector<8xf32>
    %11 = vector.shape_cast %10 : vector<8xf32> to vector<1x8xf32>
    %12 = vector.broadcast %11 : vector<1x8xf32> to vector<16x8xf32>
    %13 = arith.addf %8, %12 : vector<16x8xf32>
    %cst_12 = arith.constant dense<0xFF800000> : vector<16xf32>
    %14 = vector.multi_reduction <maximumf>, %13, %cst_12 [1] : vector<16x8xf32> to vector<16xf32>
    %15 = vector.shape_cast %14 : vector<16xf32> to vector<16x1xf32>
    %16 = vector.broadcast %15 : vector<16x1xf32> to vector<16x8xf32>
    %17 = arith.subf %13, %16 : vector<16x8xf32>
    %18 = math.exp %17 : vector<16x8xf32>
    %cst_13 = arith.constant dense<0.000000e+00> : vector<16xf32>
    %19 = vector.multi_reduction <add>, %18, %cst_13 [1] : vector<16x8xf32> to vector<16xf32>
    %20 = vector.shape_cast %19 : vector<16xf32> to vector<16x1xf32>
    %21 = tpu.reciprocal %20 {approx = true} : vector<16x1xf32> -> vector<16x1xf32>
    %22 = arith.mulf %20, %21 : vector<16x1xf32>
    %cst_14 = arith.constant 2.000000e+00 : f32
    %23 = vector.broadcast %cst_14 : f32 to vector<16x1xf32>
    %24 = arith.subf %23, %22 : vector<16x1xf32>
    %25 = arith.mulf %21, %24 : vector<16x1xf32>
    %26 = vector.broadcast %25 : vector<16x1xf32> to vector<16x8xf32>
    %27 = arith.mulf %18, %26 : vector<16x8xf32>
    %c0_15 = arith.constant 0 : index
    %c0_16 = arith.constant 0 : index
    %c0_17 = arith.constant 0 : index
    %28 = vector.load %arg5[%c0_15, %c0_16, %c0_17] : memref<1x8x32xf32, #tpu.memory_space<vmem>>, vector<1x8x32xf32>
    %29 = vector.shape_cast %28 : vector<1x8x32xf32> to vector<8x32xf32>
    %cst_18 = arith.constant dense<0.000000e+00> : vector<16x32xf32>
    %30 = tpu.matmul %27, %29, %cst_18 {dimension_numbers = #tpu.dot_dimension_numbers<[1], [0], [0], [1], [0, 0, 1, 1], [], []>} : vector<16x8xf32>, vector<8x32xf32>, vector<16x32xf32> -> vector<16x32xf32>
    %c0_19 = arith.constant 0 : index
    %c0_20 = arith.constant 0 : index
    %c0_21 = arith.constant 0 : index
    %31 = vector.load %arg7[%c0_19, %c0_20, %c0_21] : memref<1x16x32xf32, #tpu.memory_space<vmem>>, vector<1x16x32xf32>
    %32 = vector.shape_cast %31 : vector<1x16x32xf32> to vector<16x32xf32>
    %33 = vector.shape_cast %30 : vector<16x32xf32> to vector<1x16x32xf32>
    tpu.vector_store %arg7[%c0_19, %c0_20, %c0_21], %33 {strides = array<i32>} : memref<1x16x32xf32, #tpu.memory_space<vmem>>, vector<1x16x32xf32>,
    return
  }
  func.func @transform_0(%arg0: i32, %arg1: i32) -> (i32, i32) {
    %c0_i32 = arith.constant 0 : i32
    %c0_i32_0 = arith.constant 0 : i32
    %c0_i32_1 = arith.constant 0 : i32
    return %c0_i32, %c0_i32_0 : i32, i32
  }
  func.func @transform_1(%arg0: i32, %arg1: i32) -> (i32, i32, i32) {
    %c0_i32 = arith.constant 0 : i32
    %c0_i32_0 = arith.constant 0 : i32
    return %arg0, %arg1, %c0_i32 : i32, i32, i32
  }
  func.func @transform_2(%arg0: i32, %arg1: i32) -> (i32, i32, i32) {
    %c0_i32 = arith.constant 0 : i32
    %c0_i32_0 = arith.constant 0 : i32
    %c0_i32_1 = arith.constant 0 : i32
    return %arg0, %c0_i32, %c0_i32_0 : i32, i32, i32
  }
  func.func @transform_3(%arg0: i32, %arg1: i32) -> (i32, i32, i32) {
    %c0_i32 = arith.constant 0 : i32
    %c0_i32_0 = arith.constant 0 : i32
    %c0_i32_1 = arith.constant 0 : i32
    return %arg0, %c0_i32, %c0_i32_0 : i32, i32, i32
  }
  func.func @transform_4(%arg0: i32, %arg1: i32) -> (i32, i32, i32) {
    %c0_i32 = arith.constant 0 : i32
    %c0_i32_0 = arith.constant 0 : i32
    %c0_i32_1 = arith.constant 0 : i32
    return %arg0, %c0_i32, %c0_i32_0 : i32, i32, i32
  }
  func.func @transform_5(%arg0: i32, %arg1: i32) -> (i32, i32, i32) {
    %c0_i32 = arith.constant 0 : i32
    %c0_i32_0 = arith.constant 0 : i32
    return %arg0, %arg1, %c0_i32 : i32, i32, i32
  }
}

</mosaic_0001>

<bundles_post_ra>
// kernel: tpu_custom_call.1
= control target key start
LH: loop header
LB: loop body
LE: loop exit
PB: predicated region body
PF: predicated region fallthrough
CT: control target
= control target key end

     0   :  { %10 = vsyncpa [#allocation3], 0  ;;  %s1134_s0 = inlined_call_operand.vmem [shape: f32[32,32], index: 0, kind: input, shape index: {}]   ;;  %s1135_s1 = inlined_call_operand.vmem [shape: f32[2,16,32], index: 1, kind: input, shape index: {}]   ;;  %s1136_s2 = inlined_call_operand.vmem [shape: f32[2,32,8], index: 2, kind: input, shape index: {}]   ;;  %s1137_s3 = inlined_call_operand.vmem [shape: f32[2,8,32], index: 3, kind: input, shape index: {}]   ;;  %s1138_s4 = inlined_call_operand.vmem [shape: f32[2,1,8], index: 4, kind: input, shape index: {}]   ;;  %s1139_s5 = inlined_call_operand.hbm [shape: f32[2,16,32], index: 5, kind: output, shape index: {}]  }
   0x1   :  { %12 = vsyncpa [#allocation3 + $0x1], 0  ;;  %s981_s18 = smov 0   ;;  %s983_s19 = smov 0  }
   0x2   :  { %s985_s20 = smov 0   ;;  %s987_s21 = smov 0  }
   0x3   :  { %s989_s22 = smov 0   ;;  %s991_s23 = smov 0  }
   0x4 LB: > { %s737_s24 = sadd.s32 4294967295, %s946_s23   ;;  %s738_s25 = sadd.s32 4294967294, %s946_s23   ;;  %s946_s23 = sphi %s991_s23, %s18_s23   ;;  %s942_s22 = sphi %s989_s22, %s1146_s22   ;;  %s938_s21 = sphi %s987_s21, %s1145_s21   ;;  %s934_s20 = sphi %s985_s20, %s1144_s20   ;;  %s930_s19 = sphi %s983_s19, %s1143_s19   ;;  %s926_s18 = sphi %s981_s18, %s1142_s18  }
   0x5   : > { %s30_s26 = sadd.s32 1, %s942_s22  ;;  %s166_s27 = sadd.s32 1, %s934_s20 }
   0x6   : > { %p32_p0 = scmp.ge.s32.totalorder %s30_s26, 2  ;;  %p176_p1 = scmp.ne.s32.totalorder %s934_s20, %s930_s19 }
   0x7   : > { %p177_p2 = scmp.eq.s32.totalorder %s737_s24, 1  ;;  %p182_p3 = scmp.ne.s32.totalorder %s930_s19, %s926_s18 }
   0x8   : > { %s1148_s26 = smov (%p32_p0, %s30_s26), 0  ;;  %p183_p5 = scmp.eq.s32.totalorder %s738_s25, 1 }
   0x9   : > { %p1021_p4 = por %p177_p2, %p176_p1  ;;  %s161_s29 = ssub.s32 %s942_s22, %s1148_s26 }
   0xa   : > { %p741_p6 = scmp.ge.s32.totalorder %s946_s23, 1  ;;  %p164_p7 = scmp.eq.s32.totalorder %s161_s29, 0 }
   0xb   : > { %p1028_p8 = por %p183_p5, %p182_p3  ;;  %p238_p9 = scmp.lt.s32.totalorder %s946_s23, 3 }
   0xc   : > { %s1034_s6 = scalar_select %p164_p7, %s934_s20, %s166_s27  }
   0xd   : > { %p239_p10 = pnand %p741_p6, %p238_p9 }
   0xe   : > { %p283_p11 = scmp.lt.s32.totalorder (!%p239_p10), %s938_s21, 1 }
   0xf   : > { %242 = sbr.rel (%p239_p10) target bundleno = 955 (0x3bb), region = 40 }
  0x14   : > { %v310_v0 = vld [vmem:[%s1134_s0 + $0x18] sm:$0xff]  ;;  %v309_v1 = vld [vmem:[%s1134_s0 + $0x10] sm:$0xff]  ;;  %v308_v2 = vld [vmem:[%s1134_s0 + $0x8] sm:$0xff]  ;;  %s1047_s13 = scalar_select %p283_p11, %s938_s21, 1  ;;  %vm311_vm0 = vcmask 261120   ;;  %vm487_vm1 = vcmask 64512  }
  0x15   : > { %778 = vmatprep.subr.mxu0 %v310_v0  ;;  %v307_v3 = vld [vmem:[%s1134_s0] sm:$0xff] }
  0x16   : > { %779 = vmatpush3.msra.mxu0 %v310_v0  ;;  %s760_s16 = sshll.u32 %s1047_s13, 4  ;;  %s761_s17 = sshll.u32 %s1047_s13, 5 }
  0x17   : > { %780 = vmatprep.subr.mxu0 %v309_v1  ;;  %s290_s27 = scalar_lea.vmem %s1135_s1, %s760_s16  ;;  %s296_s8 = scalar_lea.vmem %s1136_s2, %s761_s17 }
  0x18   : > { %781 = vmatpush3.msra.mxu0 %v309_v1  ;;  %v305_v4 = vld [vmem:[%s290_s27] sm:$0xff]  ;;  %v306_v5 = vld [vmem:[%s290_s27 + $0x8] sm:$0xff]  ;;  %v398_v6 = vld [vmem:[%s296_s8 + $0x18] sm:$0xff]  ;;  %s303_s11 = scalar_lea.vmem %s1138_s4, %s1047_s13  ;;  %s747_s12 = sshll.u32 %s1047_s13, 3 }
  0x19   : > { %782 = vmatprep.subr.mxu0 %v308_v2  ;;  %786 = vmatprep.mubr.msk.f32.mxu0 %vm311_vm0, %v305_v4  ;;  %v397_v7 = vld [vmem:[%s296_s8 + $0x10] sm:$0xff]  ;;  %v396_v8 = vld [vmem:[%s296_s8 + $0x8] sm:$0xff]  ;;  %v395_v9 = vld [vmem:[%s296_s8] sm:$0xff]  ;;  %s300_s16 = scalar_lea.vmem %s1137_s3, %s747_s12  ;;  %s279_s13 = sand.u32 1, %s930_s19  }
  0x1a   : > { %783 = vmatpush3.msra.mxu0 %v308_v2  ;;  %789 = vmatprep.subr.mxu1 %v398_v6  ;;  %v750_v15 = vld [vmem:[%s303_s11] ss:$0 sm:$0xff]  ;;  %s742_s17 = sshll.u32 %s279_s13, 4  ;;  %s762_s27 = sshll.u32 %s938_s21, 8 }
  0x1b   : > { %784 = vmatprep.subr.mxu0 %v307_v3  ;;  %790 = vmatpush3.msra.mxu1 %v398_v6  ;;  %v516_v31 = vld [vmem:[%s300_s16] sm:$0xff]  ;;  %s281_s24 = scalar_lea.vmem [#allocation2], %s742_s17  ;;  %s1085_s8 = scalar_lea.hbm %s1139_s5, %s762_s27 }
  0x1c   : > { %785 = vmatpush3.msra.mxu0 %v307_v3  ;;  %791 = vmatprep.subr.mxu1 %v397_v7  ;;  %s616_s25 = sshll.u32 %s281_s24, 4  ;;  %s1089_s9 = scalar_lea.sflag [#allocation3], %s279_s13  ;;  %s1080_s25 = int_to_ptr.vmem [resolvable:$true] %s616_s25 }
  0x1d   : > { %787 = vmatmul.mubr.msk.f32.vlgmr.msra.gmra.mxu0 %vm311_vm0, %v306_v5  ;;  %792 = vmatpush3.msra.mxu1 %v397_v7  ;;  %s870_s10 = scalar_lea.vmem %s1080_s25, 256  ;;  %s948_s21 = smov [#allocation2]  }
  0x1e   : > { %793 = vmatprep.subr.mxu1 %v396_v8  ;;  %800 = vmatprep.subr.mxu0 %v516_v31  ;;  %p871_p12 = scmp.ne.s32.totalorder %s1080_s25, %s870_s10  ;;  %s874_s11 = sshll.u32 %s948_s21, 4  ;;  %s875_s11 = int_to_ptr.vmem [resolvable:$false] %s874_s11 }
  0x1f   : > { %794 = vmatpush3.msra.mxu1 %v396_v8  ;;  %801 = vmatpush3.msra.mxu0 %v516_v31  ;;  %s876_s12 = scalar_lea.vmem %s875_s11, 512  ;;  %p877_p1 = scmp.lt.s32.totalorder %s1080_s25, %s875_s11 }
  0x20   : > { %795 = vmatprep.subr.mxu1 %v395_v9  ;;  %p872_p13 = pnand %p871_p12, %p1021_p4  ;;  %p878_p2 = scmp.lt.s32.totalorder %s876_s12, %s870_s10 }
  0x21   : > { %796 = vmatpush3.msra.mxu1 %v395_v9 }
  0x22   : > { %p873_p0 = pneg %p872_p13  ;;  %p879_p3 = por %p878_p2, %p877_p1 }
  0x24   : > { %p880_p5 = pnand %p879_p3, %p873_p0 }
  0xdd   : > { %v788_v10 = vpop.f32.mrf.mxu0 }
  0xde   : > { %v394_v13 = vmax.f32 %v788_v10, 0.0 }
  0xdf   : > { %v384_v11 = vpop.f32.mrf.mxu0 }
  0xe0   : > { %v393_v12 = vmax.f32 %v384_v11, 0.0 }
  0xe2   : > { %797 = vmatprep.mubr.msk.f32.mxu1 %vm311_vm0, %v393_v12 }
  0xe3   : > { %798 = vmatmul.mubr.msk.f32.vlgmr.msra.gmra.mxu1 %vm311_vm0, %v394_v13 }
 0x1a3   : > { %v799_v14 = vpop.f32.mrf.mxu1 }
 0x1a4   : > { %v484_v18 = vadd.f32 %v799_v14, %v750_v15 }
 0x1a5   : > { %v478_v16 = vpop.f32.mrf.mxu1 }
 0x1a6   : > { %v479_v17 = vadd.f32 %v750_v15, %v478_v16  ;;  %v491_v20 = vsel %vm487_vm1, %v484_v18, -inf }
 0x1a8   : > { %v488_v19 = vsel %vm487_vm1, %v479_v17, -inf }
 0x1a9   : > { %489 = vmax.xlane.f32.xlu0 %v488_v19 }
 0x1ad   : > { %492 = vmax.xlane.f32.xlu0 %v491_v20 }
 0x232   : > { %v490_v21 = vpop.xlane.xlu0 %489 }
 0x233   : > { %v494_v22 = vsub.f32 %v479_v17, %v490_v21 }
 0x235   : > { %v496_v23 = vmul.f32 1.442695, %v494_v22 }
 0x236   : > { %v493_v24 = vpop.xlane.xlu0 %492 }
 0x237   : > { %862 = vpow2.f32 %v496_v23  ;;  %v495_v25 = vsub.f32 %v484_v18, %v493_v24 }
 0x239   : > { %v498_v26 = vmul.f32 1.442695, %v495_v25 }
 0x23b   : > { %864 = vpow2.f32 %v498_v26 }
 0x244   : > { %v863_v27 = vpop.eup %862 }
 0x245   : > { %v500_v28 = vsel %vm487_vm1, %v863_v27, 0.0 }
 0x246   : > { %501 = vadd.xlane.f32.xlu1 %v500_v28 }
 0x248   : > { %v865_v29 = vpop.eup %864 }
 0x249   : > { %v503_v30 = vsel %vm487_vm1, %v865_v29, 0.0 }
 0x24a   : > { %504 = vadd.xlane.f32.xlu1 %v503_v30 }
 0x2cf   : > { %v502_v32 = vpop.xlane.xlu1 %501 }
 0x2d0   : > { %866 = vrcp.f32 %v502_v32 }
 0x2d3   : > { %v505_v33 = vpop.xlane.xlu1 %504 }
 0x2d4   : > { %868 = vrcp.f32 %v505_v33 }
 0x2dd   : > { %v867_v34 = vpop.eup %866 }
 0x2de   : > { %v508_v35 = vmul.f32 %v867_v34, %v502_v32 }
 0x2e0   : > { %v510_v36 = vsub.f32 2.0, %v508_v35 }
 0x2e1   : > { %v869_v37 = vpop.eup %868 }
 0x2e2   : > { %v512_v38 = vmul.f32 %v867_v34, %v510_v36  ;;  %v509_v39 = vmul.f32 %v869_v37, %v505_v33 }
 0x2e4   : > { %v514_v40 = vmul.f32 %v863_v27, %v512_v38  ;;  %v511_v41 = vsub.f32 2.0, %v509_v39 }
 0x2e6   : > { %v513_v42 = vmul.f32 %v869_v37, %v511_v41  ;;  %802 = vmatprep.mubr.msk.f32.mxu0 %vm487_vm1, %v514_v40 }
 0x2e8   : > { %v515_v43 = vmul.f32 %v865_v29, %v513_v42 }
 0x2ea   : > { %803 = vmatmul.mubr.msk.f32.vlgmr.msra.gmra.mxu0 %vm487_vm1, %v515_v43 }
 0x3aa   : > { %v804_v44 = vpop.f32.mrf.mxu0 }
 0x3ab   : > { %599 = vst.msk [vmem:[%s281_s24 + $0x8] sm:$0xff] %vm311_vm0, %v804_v44 }
 0x3ac   : > { %v589_v45 = vpop.f32.mrf.mxu0 }
 0x3ad   : > { %598 = vst.msk [vmem:[%s281_s24] sm:$0xff] %vm311_vm0, %v589_v45 }
 0x3ae   : > { %883 = shalt.err (!%p880_p5)
}
 0x3af   : > { %s884_s14 = scalar_lea.hbm %s1085_s8, 256  ;;  %s888_s13 = scalar_lea.hbm %s1139_s5, 512 }
 0x3b0   : > { %p885_p6 = scmp.ne.s32.totalorder %s1085_s8, %s884_s14  ;;  %p889_p10 = scmp.lt.s32.totalorder %s1085_s8, %s1139_s5 }
 0x3b1   : > { %p890_p11 = scmp.lt.s32.totalorder %s888_s13, %s884_s14 }
 0x3b2   : > { %p886_p7 = pnand %p885_p6, %p1021_p4 }
 0x3b3   : > { %p891_p12 = por %p890_p11, %p889_p10 }
 0x3b4   : > { %p887_p9 = pneg %p886_p7 }
 0x3b6   : > { %p892_p13 = pnand %p891_p12, %p887_p9 }
 0x3b8   : > { %895 = shalt.err (!%p892_p13)
}
 0x3b9   : > { %s949_s27 = smov 128   ;;  %s950_s29 = smov 8  }
 0x3ba   : > { %805 = dma.vmem_to_hbm [thread:$0]  (%p1021_p4), %s1080_s25, 256, %s1085_s8, %s1089_s9, %s949_s27, %s949_s27, %s950_s29  }
 0x3bb PF: > { %p811_p0 = scmp.ge.s32.totalorder %s946_s23, 2  ;;  %s631_s7 = sand.u32 1, %s926_s18  }
 0x3bc   : > { %s632_s10 = scalar_lea.sflag [#allocation3], %s631_s7 }
 0x3bd   : > { %p808_p1 = pnand %p811_p0, %p1028_p8 }
 0x3bf   : > { %p809_p2 = pneg %p808_p1 }
 0x3c1   : > { %921 = dma.done.wait (%p809_p2), %s632_s10, 256  }
 0x3c2   : > { %923 = vsyncadd (%p809_p2), %s632_s10, 4294967040  ;;  %s18_s23 = sadd.s32 1, %s946_s23   ;;  %s1142_s18 = smov %s930_s19 }
 0x3c3   : > { %p15_p3 = scmp.ge.s32.totalorder %s18_s23, 4   ;;  %s1143_s19 = smov %s934_s20 }
 0x3c4   : > { %s1144_s20 = smov %s1034_s6  ;;  %s1145_s21 = smov %s942_s22 }
 0x3c5   : > { %s1146_s22 = smov %s1148_s26  ;;  %17 = sbr.rel (!%p15_p3) target bundleno = 4 (0x4), region = 84 }
 0x3ca   :  { %637 = vsyncpa [#allocation3], 1 }
 0x3cb   :  { %639 = vsyncpa [#allocation3 + $0x1], 1 }

// kernel: tpu_custom_call.1
= control target key start
LH: loop header
LB: loop body
LE: loop exit
PB: predicated region body
PF: predicated region fallthrough
CT: control target
= control target key end

     0   :  { %10 = vsyncpa [#allocation3], 0  ;;  %s1125_s0 = inlined_call_operand.vmem [shape: f32[32,32], index: 0, kind: input, shape index: {}]   ;;  %s1126_s1 = inlined_call_operand.vmem [shape: f32[2,16,32], index: 1, kind: input, shape index: {}]   ;;  %s1127_s2 = inlined_call_operand.vmem [shape: f32[2,32,8], index: 2, kind: input, shape index: {}]   ;;  %s1128_s3 = inlined_call_operand.vmem [shape: f32[2,8,32], index: 3, kind: input, shape index: {}]   ;;  %s1129_s4 = inlined_call_operand.vmem [shape: f32[2,1,8], index: 4, kind: input, shape index: {}]   ;;  %s1130_s5 = inlined_call_operand.hbm [shape: f32[2,16,32], index: 5, kind: output, shape index: {}]  }
   0x1   :  { %12 = vsyncpa [#allocation3 + $0x1], 0  ;;  %s972_s18 = smov 0   ;;  %s974_s19 = smov 0  }
   0x2   :  { %s976_s20 = smov 0   ;;  %s978_s21 = smov 0  }
   0x3   :  { %s980_s22 = smov 0   ;;  %s982_s23 = smov 0  }
   0x4 LB: > { %s728_s24 = sadd.s32 4294967295, %s937_s23   ;;  %s729_s25 = sadd.s32 4294967294, %s937_s23   ;;  %s937_s23 = sphi %s982_s23, %s18_s23   ;;  %s933_s22 = sphi %s980_s22, %s1137_s22   ;;  %s929_s21 = sphi %s978_s21, %s1136_s21   ;;  %s925_s20 = sphi %s976_s20, %s1135_s20   ;;  %s921_s19 = sphi %s974_s19, %s1134_s19   ;;  %s917_s18 = sphi %s972_s18, %s1133_s18  }
   0x5   : > { %s30_s26 = sadd.s32 1, %s933_s22  ;;  %s166_s27 = sadd.s32 1, %s925_s20 }
   0x6   : > { %p32_p0 = scmp.ge.s32.totalorder %s30_s26, 2  ;;  %p176_p1 = scmp.ne.s32.totalorder %s925_s20, %s921_s19 }
   0x7   : > { %p177_p2 = scmp.eq.s32.totalorder %s728_s24, 1  ;;  %p182_p3 = scmp.ne.s32.totalorder %s921_s19, %s917_s18 }
   0x8   : > { %s1139_s26 = smov (%p32_p0, %s30_s26), 0  ;;  %p183_p5 = scmp.eq.s32.totalorder %s729_s25, 1 }
   0x9   : > { %p1012_p4 = por %p177_p2, %p176_p1  ;;  %s161_s29 = ssub.s32 %s933_s22, %s1139_s26 }
   0xa   : > { %p732_p6 = scmp.ge.s32.totalorder %s937_s23, 1  ;;  %p164_p7 = scmp.eq.s32.totalorder %s161_s29, 0 }
   0xb   : > { %p1019_p8 = por %p183_p5, %p182_p3  ;;  %p238_p9 = scmp.lt.s32.totalorder %s937_s23, 3 }
   0xc   : > { %s1025_s6 = scalar_select %p164_p7, %s925_s20, %s166_s27  }
   0xd   : > { %p239_p10 = pnand %p732_p6, %p238_p9 }
   0xe   : > { %p283_p11 = scmp.lt.s32.totalorder (!%p239_p10), %s929_s21, 1 }
   0xf   : > { %242 = sbr.rel (%p239_p10) target bundleno = 955 (0x3bb), region = 40 }
  0x14   : > { %v310_v0 = vld [vmem:[%s1125_s0 + $0x18] sm:$0xff]  ;;  %v309_v1 = vld [vmem:[%s1125_s0 + $0x10] sm:$0xff]  ;;  %v308_v2 = vld [vmem:[%s1125_s0 + $0x8] sm:$0xff]  ;;  %s1038_s13 = scalar_select %p283_p11, %s929_s21, 1  ;;  %vm311_vm0 = vcmask 261120   ;;  %vm487_vm1 = vcmask 64512  }
  0x15   : > { %769 = vmatprep.subr.mxu0 %v310_v0  ;;  %v307_v3 = vld [vmem:[%s1125_s0] sm:$0xff] }
  0x16   : > { %770 = vmatpush3.msra.mxu0 %v310_v0  ;;  %s751_s16 = sshll.u32 %s1038_s13, 4  ;;  %s752_s17 = sshll.u32 %s1038_s13, 5 }
  0x17   : > { %771 = vmatprep.subr.mxu0 %v309_v1  ;;  %s290_s27 = scalar_lea.vmem %s1126_s1, %s751_s16  ;;  %s296_s8 = scalar_lea.vmem %s1127_s2, %s752_s17 }
  0x18   : > { %772 = vmatpush3.msra.mxu0 %v309_v1  ;;  %v305_v4 = vld [vmem:[%s290_s27] sm:$0xff]  ;;  %v306_v5 = vld [vmem:[%s290_s27 + $0x8] sm:$0xff]  ;;  %v398_v6 = vld [vmem:[%s296_s8 + $0x18] sm:$0xff]  ;;  %s303_s11 = scalar_lea.vmem %s1129_s4, %s1038_s13  ;;  %s738_s12 = sshll.u32 %s1038_s13, 3 }
  0x19   : > { %773 = vmatprep.subr.mxu0 %v308_v2  ;;  %777 = vmatprep.mubr.msk.f32.mxu0 %vm311_vm0, %v305_v4  ;;  %v397_v7 = vld [vmem:[%s296_s8 + $0x10] sm:$0xff]  ;;  %v396_v8 = vld [vmem:[%s296_s8 + $0x8] sm:$0xff]  ;;  %v395_v9 = vld [vmem:[%s296_s8] sm:$0xff]  ;;  %s300_s16 = scalar_lea.vmem %s1128_s3, %s738_s12  ;;  %s279_s13 = sand.u32 1, %s921_s19  }
  0x1a   : > { %774 = vmatpush3.msra.mxu0 %v308_v2  ;;  %780 = vmatprep.subr.mxu1 %v398_v6  ;;  %v741_v15 = vld [vmem:[%s303_s11] ss:$0 sm:$0xff]  ;;  %s733_s17 = sshll.u32 %s279_s13, 4  ;;  %s753_s27 = sshll.u32 %s929_s21, 8 }
  0x1b   : > { %775 = vmatprep.subr.mxu0 %v307_v3  ;;  %781 = vmatpush3.msra.mxu1 %v398_v6  ;;  %v516_v31 = vld [vmem:[%s300_s16] sm:$0xff]  ;;  %s281_s24 = scalar_lea.vmem [#allocation2], %s733_s17  ;;  %s1076_s8 = scalar_lea.hbm %s1130_s5, %s753_s27 }
  0x1c   : > { %776 = vmatpush3.msra.mxu0 %v307_v3  ;;  %782 = vmatprep.subr.mxu1 %v397_v7  ;;  %s616_s25 = sshll.u32 %s281_s24, 4  ;;  %s1080_s9 = scalar_lea.sflag [#allocation3], %s279_s13  ;;  %s1071_s25 = int_to_ptr.vmem [resolvable:$true] %s616_s25 }
  0x1d   : > { %778 = vmatmul.mubr.msk.f32.vlgmr.msra.gmra.mxu0 %vm311_vm0, %v306_v5  ;;  %783 = vmatpush3.msra.mxu1 %v397_v7  ;;  %s861_s10 = scalar_lea.vmem %s1071_s25, 256  ;;  %s939_s21 = smov [#allocation2]  }
  0x1e   : > { %784 = vmatprep.subr.mxu1 %v396_v8  ;;  %791 = vmatprep.subr.mxu0 %v516_v31  ;;  %p862_p12 = scmp.ne.s32.totalorder %s1071_s25, %s861_s10  ;;  %s865_s11 = sshll.u32 %s939_s21, 4  ;;  %s866_s11 = int_to_ptr.vmem [resolvable:$false] %s865_s11 }
  0x1f   : > { %785 = vmatpush3.msra.mxu1 %v396_v8  ;;  %792 = vmatpush3.msra.mxu0 %v516_v31  ;;  %s867_s12 = scalar_lea.vmem %s866_s11, 512  ;;  %p868_p1 = scmp.lt.s32.totalorder %s1071_s25, %s866_s11 }
  0x20   : > { %786 = vmatprep.subr.mxu1 %v395_v9  ;;  %p863_p13 = pnand %p862_p12, %p1012_p4  ;;  %p869_p2 = scmp.lt.s32.totalorder %s867_s12, %s861_s10 }
  0x21   : > { %787 = vmatpush3.msra.mxu1 %v395_v9 }
  0x22   : > { %p864_p0 = pneg %p863_p13  ;;  %p870_p3 = por %p869_p2, %p868_p1 }
  0x24   : > { %p871_p5 = pnand %p870_p3, %p864_p0 }
  0xdd   : > { %v779_v10 = vpop.f32.mrf.mxu0 }
  0xde   : > { %v394_v13 = vmax.f32 %v779_v10, 0.0 }
  0xdf   : > { %v384_v11 = vpop.f32.mrf.mxu0 }
  0xe0   : > { %v393_v12 = vmax.f32 %v384_v11, 0.0 }
  0xe2   : > { %788 = vmatprep.mubr.msk.f32.mxu1 %vm311_vm0, %v393_v12 }
  0xe3   : > { %789 = vmatmul.mubr.msk.f32.vlgmr.msra.gmra.mxu1 %vm311_vm0, %v394_v13 }
 0x1a3   : > { %v790_v14 = vpop.f32.mrf.mxu1 }
 0x1a4   : > { %v484_v18 = vadd.f32 %v790_v14, %v741_v15 }
 0x1a5   : > { %v478_v16 = vpop.f32.mrf.mxu1 }
 0x1a6   : > { %v479_v17 = vadd.f32 %v741_v15, %v478_v16  ;;  %v491_v20 = vsel %vm487_vm1, %v484_v18, -inf }
 0x1a8   : > { %v488_v19 = vsel %vm487_vm1, %v479_v17, -inf }
 0x1a9   : > { %489 = vmax.xlane.f32.xlu0 %v488_v19 }
 0x1ad   : > { %492 = vmax.xlane.f32.xlu0 %v491_v20 }
 0x232   : > { %v490_v21 = vpop.xlane.xlu0 %489 }
 0x233   : > { %v494_v22 = vsub.f32 %v479_v17, %v490_v21 }
 0x235   : > { %v496_v23 = vmul.f32 1.442695, %v494_v22 }
 0x236   : > { %v493_v24 = vpop.xlane.xlu0 %492 }
 0x237   : > { %853 = vpow2.f32 %v496_v23  ;;  %v495_v25 = vsub.f32 %v484_v18, %v493_v24 }
 0x239   : > { %v498_v26 = vmul.f32 1.442695, %v495_v25 }
 0x23b   : > { %855 = vpow2.f32 %v498_v26 }
 0x244   : > { %v854_v27 = vpop.eup %853 }
 0x245   : > { %v500_v28 = vsel %vm487_vm1, %v854_v27, 0.0 }
 0x246   : > { %501 = vadd.xlane.f32.xlu1 %v500_v28 }
 0x248   : > { %v856_v29 = vpop.eup %855 }
 0x249   : > { %v503_v30 = vsel %vm487_vm1, %v856_v29, 0.0 }
 0x24a   : > { %504 = vadd.xlane.f32.xlu1 %v503_v30 }
 0x2cf   : > { %v502_v32 = vpop.xlane.xlu1 %501 }
 0x2d0   : > { %857 = vrcp.f32 %v502_v32 }
 0x2d3   : > { %v505_v33 = vpop.xlane.xlu1 %504 }
 0x2d4   : > { %859 = vrcp.f32 %v505_v33 }
 0x2dd   : > { %v858_v34 = vpop.eup %857 }
 0x2de   : > { %v508_v35 = vmul.f32 %v858_v34, %v502_v32 }
 0x2e0   : > { %v510_v36 = vsub.f32 2.0, %v508_v35 }
 0x2e1   : > { %v860_v37 = vpop.eup %859 }
 0x2e2   : > { %v512_v38 = vmul.f32 %v858_v34, %v510_v36  ;;  %v509_v39 = vmul.f32 %v860_v37, %v505_v33 }
 0x2e4   : > { %v514_v40 = vmul.f32 %v854_v27, %v512_v38  ;;  %v511_v41 = vsub.f32 2.0, %v509_v39 }
 0x2e6   : > { %v513_v42 = vmul.f32 %v860_v37, %v511_v41  ;;  %793 = vmatprep.mubr.msk.f32.mxu0 %vm487_vm1, %v514_v40 }
 0x2e8   : > { %v515_v43 = vmul.f32 %v856_v29, %v513_v42 }
 0x2ea   : > { %794 = vmatmul.mubr.msk.f32.vlgmr.msra.gmra.mxu0 %vm487_vm1, %v515_v43 }
 0x3aa   : > { %v795_v44 = vpop.f32.mrf.mxu0 }
 0x3ab   : > { %599 = vst.msk [vmem:[%s281_s24 + $0x8] sm:$0xff] %vm311_vm0, %v795_v44 }
 0x3ac   : > { %v589_v45 = vpop.f32.mrf.mxu0 }
 0x3ad   : > { %598 = vst.msk [vmem:[%s281_s24] sm:$0xff] %vm311_vm0, %v589_v45 }
 0x3ae   : > { %874 = shalt.err (!%p871_p5)
}
 0x3af   : > { %s875_s14 = scalar_lea.hbm %s1076_s8, 256  ;;  %s879_s13 = scalar_lea.hbm %s1130_s5, 512 }
 0x3b0   : > { %p876_p6 = scmp.ne.s32.totalorder %s1076_s8, %s875_s14  ;;  %p880_p10 = scmp.lt.s32.totalorder %s1076_s8, %s1130_s5 }
 0x3b1   : > { %p881_p11 = scmp.lt.s32.totalorder %s879_s13, %s875_s14 }
 0x3b2   : > { %p877_p7 = pnand %p876_p6, %p1012_p4 }
 0x3b3   : > { %p882_p12 = por %p881_p11, %p880_p10 }
 0x3b4   : > { %p878_p9 = pneg %p877_p7 }
 0x3b6   : > { %p883_p13 = pnand %p882_p12, %p878_p9 }
 0x3b8   : > { %886 = shalt.err (!%p883_p13)
}
 0x3b9   : > { %s940_s27 = smov 128   ;;  %s941_s29 = smov 8  }
 0x3ba   : > { %796 = dma.vmem_to_hbm [thread:$0]  (%p1012_p4), %s1071_s25, 256, %s1076_s8, %s1080_s9, %s940_s27, %s940_s27, %s941_s29  }
 0x3bb PF: > { %p802_p0 = scmp.ge.s32.totalorder %s937_s23, 2  ;;  %s631_s7 = sand.u32 1, %s917_s18  }
 0x3bc   : > { %s632_s10 = scalar_lea.sflag [#allocation3], %s631_s7 }
 0x3bd   : > { %p799_p1 = pnand %p802_p0, %p1019_p8 }
 0x3bf   : > { %p800_p2 = pneg %p799_p1 }
 0x3c1   : > { %912 = dma.done.wait (%p800_p2), %s632_s10, 256  }
 0x3c2   : > { %914 = vsyncadd (%p800_p2), %s632_s10, 4294967040  ;;  %s18_s23 = sadd.s32 1, %s937_s23   ;;  %s1133_s18 = smov %s921_s19 }
 0x3c3   : > { %p15_p3 = scmp.ge.s32.totalorder %s18_s23, 4   ;;  %s1134_s19 = smov %s925_s20 }
 0x3c4   : > { %s1135_s20 = smov %s1025_s6  ;;  %s1136_s21 = smov %s933_s22 }
 0x3c5   : > { %s1137_s22 = smov %s1139_s26  ;;  %17 = sbr.rel (!%p15_p3) target bundleno = 4 (0x4), region = 84 }
 0x3ca   :  { %637 = vsyncpa [#allocation3], 1 }
 0x3cb   :  { %639 = vsyncpa [#allocation3 + $0x1], 1 }

</bundles_post_ra>
